<compile_context>
chip_gen: v7x
topology: tpu7x:2x2x1
jax: 0.10.0
libtpu: 0.0.40
codegen_flags: <defaults>
</compile_context>

<pallas_src>
import functools

import jax
import jax.numpy as jnp
from jax.experimental import pallas as pl
from jax.experimental.pallas import tpu as pltpu


def _ln_kernel(gamma_ref, beta_ref, x_ref, o_ref, *, eps, feat):
    """Unpacked path (D >= 128 or D does not divide 128): one row per block row."""
    xf = x_ref[...].astype(jnp.float32)                           # (TR, D)
    mean = jnp.sum(xf, axis=-1, keepdims=True) * (1.0 / feat)     # (TR, 1)
    diff = xf - mean
    var = jnp.sum(diff * diff, axis=-1, keepdims=True) * (1.0 / (feat - 1))
    std = jnp.sqrt(var)
    inv = pl.reciprocal(std + eps, approx=False)                  # exact; (TR, 1)
    o_ref[...] = (diff * (gamma_ref[0] * inv) + beta_ref[0]).astype(o_ref.dtype)


def _ln_packed_kernel(gamma_ref, beta_ref, seg_ref, segt_ref, x_ref, o_ref,
                      *, eps, feat):
    """Lane-packed path: each block row holds g = L // feat logical rows.

    seg  : (L, g) block-diagonal 0/1 selector (f32); segt: (g, L) transpose.
    Segmented reductions / broadcasts are MXU matmuls (MXU is otherwise idle).
    """
    hp = jax.lax.Precision.HIGHEST
    xf = x_ref[...].astype(jnp.float32)                           # (TR, L)
    seg = seg_ref[...]
    segt = segt_ref[...]

    s1 = jnp.dot(xf, seg, precision=hp, preferred_element_type=jnp.float32)
    mean = s1 * (1.0 / feat)                                      # (TR, g)
    mean_full = jnp.dot(mean, segt, precision=hp,
                        preferred_element_type=jnp.float32)       # (TR, L)
    diff = xf - mean_full                                         # two-pass: safe
    s2 = jnp.dot(diff * diff, seg, precision=hp,
                 preferred_element_type=jnp.float32)              # (TR, g)
    std = jnp.sqrt(s2 * (1.0 / (feat - 1)))                       # unbiased std
    inv = pl.reciprocal(std + eps, approx=False)                  # (TR, g)
    scale_full = jnp.dot(gamma_ref[0] * inv, segt, precision=hp,
                         preferred_element_type=jnp.float32)      # (TR, L)
    o_ref[...] = (diff * scale_full + beta_ref[0]).astype(o_ref.dtype)


def _pick_row_tile(rows, sublane, max_rows, min_steps=4):
    """Rows per block: a multiple of the dtype's packed-sublane tile (or the
    full extent), sized to the VMEM budget, but leaving >= min_steps grid
    steps so the DMA pipeline has work and v7x's two TensorCores balance."""
    if rows <= sublane:
        return rows                                   # single full-extent block
    tr = max(sublane, (max_rows // sublane) * sublane)
    step_cap = -(-rows // min_steps)                  # ceil(rows / min_steps)
    step_cap = max(sublane, ((step_cap + sublane - 1) // sublane) * sublane)
    return min(tr, step_cap)


def layer_norm(x, gamma, beta, epsilon=1e-6):
    """LayerNorm over the last axis of x (any leading dims). gamma/beta: (1,)."""
    orig_shape = x.shape
    D = int(orig_shape[-1])
    assert D >= 2, "unbiased std needs at least 2 features"

    rows_total = 1
    for s in orig_shape[:-1]:
        rows_total *= int(s)
    x2 = x.reshape(rows_total, D)

    # Lane packing: g logical rows per 128-lane vector when D divides 128.
    g = 128 // D if (D < 128 and 128 % D == 0) else 1
    rows = rows_total
    if g > 1:
        pad = (-rows_total) % g
        if pad:  # rare; keeps the packed reshape contiguous
            x2 = jnp.concatenate([x2, jnp.zeros((pad, D), x2.dtype)], axis=0)
        rows = (rows_total + pad) // g
        x2 = x2.reshape(rows, g * D)
    L = g * D

    itemsize = jnp.dtype(x.dtype).itemsize
    sublane = max(8, 32 // itemsize)   # packed-sublane tile: 8 f32 / 16 bf16 / 32 i8

    # Generation-aware VMEM budget (v5e/v6e: 128 MiB physical; v7x: 64 MiB/TC).
    try:
        vmem_cap = int(pltpu.get_tpu_info().vmem_capacity_bytes)
    except Exception:
        vmem_cap = 64 * 1024 * 1024            # conservative fallback (v7x-sized)
    if vmem_cap >= 96 * 1024 * 1024:
        vmem_budget = 96 * 1024 * 1024         # v5e/v6e: go well past the 32 MiB default
    else:
        vmem_budget = 48 * 1024 * 1024         # v7x: leave headroom below 64 MiB

    # Resident bytes per packed row: 2x double-buffered (in + out) + ~4 f32 temps.
    per_row = L * (4 * itemsize + 4 * 4)
    TR = _pick_row_tile(rows, sublane, (3 * vmem_budget // 4) // per_row)
    n_tiles = pl.cdiv(rows, TR)

    if g > 1:
        lane_seg = jnp.arange(L, dtype=jnp.int32) // D
        seg = (lane_seg[:, None] == jnp.arange(g, dtype=jnp.int32)[None, :]
               ).astype(jnp.float32)                              # (L, g)
        segt = seg.T                                              # (g, L)
        kernel = functools.partial(_ln_packed_kernel, eps=epsilon, feat=D)
        in_specs = [
            pl.BlockSpec(memory_space=pltpu.MemorySpace.SMEM),    # gamma (1,)
            pl.BlockSpec(memory_space=pltpu.MemorySpace.SMEM),    # beta  (1,)
            pl.BlockSpec((L, g), lambda i: (0, 0)),               # seg  (resident)
            pl.BlockSpec((g, L), lambda i: (0, 0)),               # segt (resident)
            pl.BlockSpec((TR, L), lambda i: (i, 0)),              # x row tile
        ]
        args = (gamma, beta, seg, segt, x2)
    else:
        kernel = functools.partial(_ln_kernel, eps=epsilon, feat=D)
        in_specs = [
            pl.BlockSpec(memory_space=pltpu.MemorySpace.SMEM),    # gamma (1,)
            pl.BlockSpec(memory_space=pltpu.MemorySpace.SMEM),    # beta  (1,)
            pl.BlockSpec((TR, L), lambda i: (i, 0)),              # x row tile
        ]
        args = (gamma, beta, x2)

    out = pl.pallas_call(
        kernel,
        out_shape=jax.ShapeDtypeStruct((rows, L), x.dtype),
        grid=(n_tiles,),
        in_specs=in_specs,
        out_specs=pl.BlockSpec((TR, L), lambda i: (i, 0)),
        compiler_params=pltpu.CompilerParams(
            dimension_semantics=("parallel",),
            vmem_limit_bytes=int(vmem_budget),
        ),
    )(*args)

    if g > 1:
        out = out.reshape(rows * g, D)
        if rows * g != rows_total:
            out = out[:rows_total]
    return out.reshape(orig_shape)


if __name__ == "__main__":
    key = jax.random.PRNGKey(0)
    eps = 1e-6

    def ref_ln(xi, gamma, beta, eps):
        d = xi.shape[-1]
        mean = jnp.mean(xi, axis=-1, keepdims=True)
        std = jnp.sqrt(jnp.sum((xi - mean) ** 2, axis=-1, keepdims=True) / (d - 1))
        return gamma[0] * (xi - mean) / (std + eps) + beta[0]

    # Deterministic parameter init (nn.Parameter(torch.ones(1)) / zeros(1)).
    gamma = jnp.ones((1,), dtype=jnp.float32)
    beta = jnp.zeros((1,), dtype=jnp.float32)

    # Primary shape from the model: (batch_size, seq_len, embedding_size).
    B, S, D = 2, 8, 32
    x = jax.random.normal(key, (B, S, D), dtype=jnp.float32)
    out = jax.block_until_ready(layer_norm(x, gamma, beta, eps))
    assert out.shape == x.shape and out.dtype == x.dtype
    assert jnp.allclose(out, ref_ln(x, gamma, beta, eps), atol=1e-5, rtol=1e-5), \
        "mismatch vs reference (packed path)"

    # Extra coverage: unpacked path (D >= 128) with multi-step grid + partial
    # last tile, and packed path that needs row padding.
    for shape in ((2, 10, 256), (1, 5, 32)):
        xi = jax.random.normal(jax.random.PRNGKey(1), shape, dtype=jnp.float32)
        oi = jax.block_until_ready(layer_norm(xi, gamma, beta, eps))
        assert jnp.allclose(oi, ref_ln(xi, gamma, beta, eps),
                            atol=1e-5, rtol=1e-5), f"mismatch at {shape}"

    print("KERNEL_OK")
</pallas_src>

<mosaic_0001>
module attributes {stable_mosaic.version = 11 : i64} {
  func.func @_ln_packed_kernel(%arg0: i32, %arg1: memref<1xf32, #tpu.memory_space<smem>>, %arg2: memref<1xf32, #tpu.memory_space<smem>>, %arg3: memref<128x4xf32, #tpu.memory_space<vmem>>, %arg4: memref<4x128xf32, #tpu.memory_space<vmem>>, %arg5: memref<4x128xf32, #tpu.memory_space<vmem>>, %arg6: memref<4x128xf32, #tpu.memory_space<vmem>>) attributes {dimension_semantics = [#tpu.dimension_semantics<parallel>], iteration_bounds = array<i64: 1>, scalar_prefetch = 0 : i64, scratch_operands = 0 : i64, tpu.core_type = #tpu.core_type<tc>, window_params = [{transform_indices = @transform_0, window_bounds = array<i64: 1>}, {transform_indices = @transform_1, window_bounds = array<i64: 1>}, {pipeline_mode = #tpu.pipeline_mode<synchronous>, transform_indices = @transform_2, window_bounds = array<i64: 128, 4>}, {pipeline_mode = #tpu.pipeline_mode<synchronous>, transform_indices = @transform_3, window_bounds = array<i64: 4, 128>}, {transform_indices = @transform_4, window_bounds = array<i64: 4, 128>}, {transform_indices = @transform_5, window_bounds = array<i64: 4, 128>}]} {
    %c0 = arith.constant 0 : index
    %c0_0 = arith.constant 0 : index
    %0 = vector.load %arg5[%c0, %c0_0] : memref<4x128xf32, #tpu.memory_space<vmem>>, vector<4x128xf32>
    %c0_1 = arith.constant 0 : index
    %c0_2 = arith.constant 0 : index
    %1 = vector.load %arg3[%c0_1, %c0_2] : memref<128x4xf32, #tpu.memory_space<vmem>>, vector<128x4xf32>
    %c0_3 = arith.constant 0 : index
    %c0_4 = arith.constant 0 : index
    %2 = vector.load %arg4[%c0_3, %c0_4] : memref<4x128xf32, #tpu.memory_space<vmem>>, vector<4x128xf32>
    %cst = arith.constant dense<0.000000e+00> : vector<4x4xf32>
    %3 = tpu.matmul %0, %1, %cst {dimension_numbers = #tpu.dot_dimension_numbers<[1], [0], [0], [1], [0, 0, 1, 1], [], []>, precision = #tpu.contract_precision<fp32>} : vector<4x128xf32>, vector<128x4xf32>, vector<4x4xf32> -> vector<4x4xf32>
    %cst_5 = arith.constant 3.125000e-02 : f32
    %4 = vector.broadcast %cst_5 : f32 to vector<4x4xf32>
    %5 = arith.mulf %3, %4 : vector<4x4xf32>
    %cst_6 = arith.constant dense<0.000000e+00> : vector<4x128xf32>
    %6 = tpu.matmul %5, %2, %cst_6 {dimension_numbers = #tpu.dot_dimension_numbers<[1], [0], [0], [1], [0, 0, 1, 1], [], []>, precision = #tpu.contract_precision<fp32>} : vector<4x4xf32>, vector<4x128xf32>, vector<4x128xf32> -> vector<4x128xf32>
    %7 = arith.subf %0, %6 : vector<4x128xf32>
    %8 = arith.mulf %7, %7 : vector<4x128xf32>
    %cst_7 = arith.constant dense<0.000000e+00> : vector<4x4xf32>
    %9 = tpu.matmul %8, %1, %cst_7 {dimension_numbers = #tpu.dot_dimension_numbers<[1], [0], [0], [1], [0, 0, 1, 1], [], []>, precision = #tpu.contract_precision<fp32>} : vector<4x128xf32>, vector<128x4xf32>, vector<4x4xf32> -> vector<4x4xf32>
    %cst_8 = arith.constant 0.0322580636 : f32
    %10 = vector.broadcast %cst_8 : f32 to vector<4x4xf32>
    %11 = arith.mulf %9, %10 : vector<4x4xf32>
    %12 = math.sqrt %11 : vector<4x4xf32>
    %cst_9 = arith.constant 9.99999997E-7 : f32
    %13 = vector.broadcast %cst_9 : f32 to vector<4x4xf32>
    %14 = arith.addf %12, %13 : vector<4x4xf32>
    %15 = tpu.reciprocal %14 : vector<4x4xf32> -> vector<4x4xf32>
    %c0_10 = arith.constant 0 : index
    %16 = memref.load %arg1[%c0_10] : memref<1xf32, #tpu.memory_space<smem>>
    %17 = vector.broadcast %16 : f32 to vector<4x4xf32>
    %18 = arith.mulf %17, %15 : vector<4x4xf32>
    %cst_11 = arith.constant dense<0.000000e+00> : vector<4x128xf32>
    %19 = tpu.matmul %18, %2, %cst_11 {dimension_numbers = #tpu.dot_dimension_numbers<[1], [0], [0], [1], [0, 0, 1, 1], [], []>, precision = #tpu.contract_precision<fp32>} : vector<4x4xf32>, vector<4x128xf32>, vector<4x128xf32> -> vector<4x128xf32>
    %20 = arith.mulf %7, %19 : vector<4x128xf32>
    %c0_12 = arith.constant 0 : index
    %21 = memref.load %arg2[%c0_12] : memref<1xf32, #tpu.memory_space<smem>>
    %22 = vector.broadcast %21 : f32 to vector<4x128xf32>
    %23 = arith.addf %20, %22 : vector<4x128xf32>
    %c0_13 = arith.constant 0 : index
    %c0_14 = arith.constant 0 : index
    %24 = vector.load %arg6[%c0_13, %c0_14] : memref<4x128xf32, #tpu.memory_space<vmem>>, vector<4x128xf32>
    tpu.vector_store %arg6[%c0_13, %c0_14], %23 {strides = array<i32>} : memref<4x128xf32, #tpu.memory_space<vmem>>, vector<4x128xf32>,
    return
  }
  func.func @transform_0(%arg0: i32) -> i32 {
    %c0_i32 = arith.constant 0 : i32
    %c0_i32_0 = arith.constant 0 : i32
    return %c0_i32 : i32
  }
  func.func @transform_1(%arg0: i32) -> i32 {
    %c0_i32 = arith.constant 0 : i32
    %c0_i32_0 = arith.constant 0 : i32
    return %c0_i32 : i32
  }
  func.func @transform_2(%arg0: i32) -> (i32, i32) {
    %c0_i32 = arith.constant 0 : i32
    %c0_i32_0 = arith.constant 0 : i32
    %c0_i32_1 = arith.constant 0 : i32
    return %c0_i32, %c0_i32_0 : i32, i32
  }
  func.func @transform_3(%arg0: i32) -> (i32, i32) {
    %c0_i32 = arith.constant 0 : i32
    %c0_i32_0 = arith.constant 0 : i32
    %c0_i32_1 = arith.constant 0 : i32
    return %c0_i32, %c0_i32_0 : i32, i32
  }
  func.func @transform_4(%arg0: i32) -> (i32, i32) {
    %c0_i32 = arith.constant 0 : i32
    %c0_i32_0 = arith.constant 0 : i32
    return %arg0, %c0_i32 : i32, i32
  }
  func.func @transform_5(%arg0: i32) -> (i32, i32) {
    %c0_i32 = arith.constant 0 : i32
    %c0_i32_0 = arith.constant 0 : i32
    return %arg0, %c0_i32 : i32, i32
  }
}

</mosaic_0001>

<bundles_post_ra>
// kernel: tpu_custom_call.1
= control target key start
LH: loop header
LB: loop body
LE: loop exit
PB: predicated region body
PF: predicated region fallthrough
CT: control target
= control target key end

     0   :  { %v3329_v3 = vmov 0.0|0.0   ;;  %vm3330_vm0 = vmmov 0   ;;  %v3331_v8 = vmov 0.0   ;;  %s3888_s0 = inlined_call_operand.<no memory space> [shape: f32[1], index: 0, kind: input, shape index: {}]   ;;  %s3889_s1 = inlined_call_operand.<no memory space> [shape: f32[1], index: 1, kind: input, shape index: {}]   ;;  %s3890_s2 = inlined_call_operand.vmem [shape: f32[128,4], index: 2, kind: input, shape index: {}]   ;;  %s3891_s3 = inlined_call_operand.vmem [shape: f32[4,128], index: 3, kind: input, shape index: {}]   ;;  %s3892_s4 = inlined_call_operand.vmem [shape: f32[4,128], index: 4, kind: input, shape index: {}]   ;;  %s3893_s5 = inlined_call_operand.hbm [shape: f32[4,128], index: 5, kind: output, shape index: {}]  }
   0x1   :  { %v24_v0 = vld [vmem:[%s3890_s2] sm:$0xff]  ;;  %v25_v1 = vld [vmem:[%s3890_s2 + $0x8] sm:$0xff]  ;;  %v26_v2 = vld [vmem:[%s3890_s2 + $0x10] sm:$0xff]  ;;  %2969 = vmatprep.subr.bf16.mxu0 %v3329_v3  ;;  %2521 = vmatprep.mubr.msk.f32.mxu0 %vm3330_vm0, %v3331_v8 }
   0x2   :  { %v42_v4 = vand.u32 4294901760, %v24_v0  ;;  %v45_v5 = vand.u32 4294901760, %v25_v1  ;;  %v27_v6 = vld [vmem:[%s3890_s2 + $0x18] sm:$0xff]  ;;  %v48_v7 = vand.u32 4294901760, %v26_v2  ;;  %v28_v10 = vld [vmem:[%s3890_s2 + $0x20] sm:$0xff]  ;;  %v29_v11 = vld [vmem:[%s3890_s2 + $0x28] sm:$0xff]  ;;  %2699 = vmatprep.subr.mxu1 %v3331_v8  ;;  %2701 = vmatprep.mubr.msk.f32.mxu1 %vm3330_vm0, %v3331_v8 }
   0x3   :  { %v51_v9 = vand.u32 4294901760, %v27_v6  ;;  %v54_v14 = vand.u32 4294901760, %v28_v10  ;;  %v57_v15 = vand.u32 4294901760, %v29_v11  ;;  %v30_v16 = vld [vmem:[%s3890_s2 + $0x30] sm:$0xff]  ;;  %v31_v17 = vld [vmem:[%s3890_s2 + $0x38] sm:$0xff] }
   0x4   :  { %v3387_v12 = vpack.c.bf16 %v45_v5, %v42_v4 }
   0x5   :  { %v3390_v13 = vpack.c.bf16 %v51_v9, %v48_v7 }
   0x6   :  { %2971 = vmatpush3.bf16.msra.mxu0 %v3387_v12 }
   0x7   :  { %2972 = vmatprep.subr.bf16.mxu0 %v3329_v3 }
   0x8   :  { %12 = vsyncpa [#allocation5], 0  ;;  %v3400_v18 = vpack.c.bf16 %v57_v15, %v54_v14  ;;  %v60_v19 = vand.u32 4294901760, %v30_v16  ;;  %v63_v20 = vand.u32 4294901760, %v31_v17  ;;  %v32_v21 = vld [vmem:[%s3890_s2 + $0x40] sm:$0xff]  ;;  %v33_v23 = vld [vmem:[%s3890_s2 + $0x48] sm:$0xff]  ;;  %v3438_v34 = vsub.f32 %v24_v0, %v42_v4 }
   0x9   :  { %v3408_v22 = vld [vmem:[%s3892_s4] sm:$0xf]  ;;  %v34_v24 = vld [vmem:[%s3890_s2 + $0x50] sm:$0xff]  ;;  %v35_v25 = vld [vmem:[%s3890_s2 + $0x58] sm:$0xff]  ;;  %v66_v27 = vand.u32 4294901760, %v32_v21  ;;  %v69_v33 = vand.u32 4294901760, %v33_v23  ;;  %v3440_v35 = vsub.f32 %v25_v1, %v45_v5  ;;  %v3447_v43 = vsub.f32 %v26_v2, %v48_v7 }
   0xa   :  { %2974 = vmatpush3.bf16.msra.mxu0 %v3390_v13  ;;  %v36_v26 = vld [vmem:[%s3890_s2 + $0x60] sm:$0xff]  ;;  %v37_v28 = vld [vmem:[%s3890_s2 + $0x68] sm:$0xff]  ;;  %v38_v29 = vld [vmem:[%s3890_s2 + $0x70] sm:$0xff]  ;;  %v3433_v31 = vand.u32 4294901760, %v3408_v22  ;;  %v3436_v32 = vpack.c.bf16 %v63_v20, %v60_v19  ;;  %v72_v36 = vand.u32 4294901760, %v34_v24  ;;  %v75_v37 = vand.u32 4294901760, %v35_v25 }
   0xb   :  { %2975 = vmatprep.subr.bf16.mxu0 %v3329_v3  ;;  %v39_v30 = vld [vmem:[%s3890_s2 + $0x78] sm:$0xff]  ;;  %v78_v38 = vand.u32 4294901760, %v36_v26  ;;  %v81_v39 = vand.u32 4294901760, %v37_v28  ;;  %v84_v40 = vand.u32 4294901760, %v38_v29  ;;  %v3449_v44 = vsub.f32 %v27_v6, %v51_v9  ;;  %s3332_s29 = smov [#allocation4]  }
   0xc   :  { %v87_v41 = vand.u32 4294901760, %v39_v30  ;;  %v3445_v42 = vsub.f32 %v3408_v22, %v3433_v31  ;;  %v3452_v45 = vpack.c.bf16 %v69_v33, %v66_v27  ;;  %v135_v46 = vand.u32 4294901760, %v3438_v34  ;;  %s2253_s30 = sshll.u32 %s3332_s29, 4  ;;  %s2254_s30 = int_to_ptr.vmem [resolvable:$true] %s2253_s30 }
   0xd   :  { %v142_v47 = vand.u32 4294901760, %v3440_v35  ;;  %v3456_v48 = vsub.f32 %v28_v10, %v54_v14  ;;  %v3459_v49 = vpack.c.bf16 %v75_v37, %v72_v36  ;;  %v3461_v50 = vpack.c.bf16 %v81_v39, %v78_v38  ;;  %s3305_s6 = scalar_lea.vmem %s2254_s30, 64  ;;  %p3310_p1 = scmp.lt.s32.totalorder %s2254_s30, %s2254_s30 }
   0xe   :  { %2977 = vmatpush3.bf16.msra.mxu0 %v3400_v18  ;;  %v3463_v51 = vpack.c.bf16 %v87_v41, %v84_v40  ;;  %v124_v52 = vand.u32 4294901760, %v3445_v42  ;;  %v149_v53 = vand.u32 4294901760, %v3447_v43  ;;  %v156_v54 = vand.u32 4294901760, %v3449_v44  ;;  %p3306_p0 = scmp.ne.s32.totalorder %s2254_s30, %s3305_s6  ;;  %p3311_p2 = scmp.lt.s32.totalorder %s3305_s6, %s3305_s6 }
   0xf   :  { %2978 = vmatprep.subr.bf16.mxu0 %v3329_v3  ;;  %v3468_v55 = vsub.f32 %v29_v11, %v57_v15  ;;  %v136_v56 = vsub.f32 %v3438_v34, %v135_v46  ;;  %v143_v57 = vsub.f32 %v3440_v35, %v142_v47  ;;  %v163_v58 = vand.u32 4294901760, %v3456_v48 }
  0x10   :  { %v3474_v59 = vsub.f32 %v30_v16, %v60_v19  ;;  %v3477_v60 = vsub.f32 %v31_v17, %v63_v20  ;;  %v3479_v61 = vsub.f32 %v32_v21, %v66_v27  ;;  %v3481_v62 = vsub.f32 %v33_v23, %v69_v33  ;;  %p3312_p3 = por %p3311_p2, %p3310_p1 }
  0x11   :  { %v3483_v63 = vsub.f32 %v34_v24, %v72_v36  ;;  %v3485_v0 = vsub.f32 %v35_v25, %v75_v37  ;;  %v3487_v1 = vsub.f32 %v36_v26, %v78_v38  ;;  %v3489_v2 = vsub.f32 %v37_v28, %v81_v39 }
  0x12   :  { %2980 = vmatpush3.bf16.msra.mxu0 %v3436_v32  ;;  %v3491_v4 = vsub.f32 %v38_v29, %v84_v40  ;;  %v125_v5 = vsub.f32 %v3445_v42, %v124_v52  ;;  %v150_v6 = vsub.f32 %v3447_v43, %v149_v53  ;;  %v170_v7 = vand.u32 4294901760, %v3468_v55  ;;  %p3313_p4 = pnand %p3312_p3, %p3306_p0 }
  0x13   :  { %2981 = vmatprep.subr.bf16.mxu0 %v3329_v3  ;;  %v3498_v9 = vsub.f32 %v39_v30, %v87_v41  ;;  %v137_v10 = vand.u32 4294901760, %v136_v56  ;;  %v144_v11 = vand.u32 4294901760, %v143_v57  ;;  %v157_v14 = vsub.f32 %v3449_v44, %v156_v54 }
  0x14   :  { %v177_v15 = vand.u32 4294901760, %v3474_v59  ;;  %v184_v16 = vand.u32 4294901760, %v3477_v60  ;;  %v191_v17 = vand.u32 4294901760, %v3479_v61  ;;  %v198_v19 = vand.u32 4294901760, %v3481_v62 }
  0x15   :  { %v205_v20 = vand.u32 4294901760, %v3483_v63  ;;  %v212_v21 = vand.u32 4294901760, %v3485_v0  ;;  %v219_v23 = vand.u32 4294901760, %v3487_v1  ;;  %v226_v24 = vand.u32 4294901760, %v3489_v2 }
  0x16   :  { %2983 = vmatpush3.bf16.msra.mxu0 %v3452_v45  ;;  %v233_v25 = vand.u32 4294901760, %v3491_v4  ;;  %v240_v26 = vand.u32 4294901760, %v3498_v9  ;;  %v3513_v27 = vpack.c.bf16 %v142_v47, %v135_v46  ;;  %v3515_v28 = vpack.c.bf16 %v156_v54, %v149_v53 }
  0x17   :  { %2984 = vmatprep.subr.bf16.mxu0 %v3329_v3  ;;  %v3517_v29 = vpack.c.bf16 %v170_v7, %v163_v58  ;;  %v3520_v30 = vpack.c.bf16 %v184_v16, %v177_v15  ;;  %v3522_v33 = vpack.c.bf16 %v198_v19, %v191_v17  ;;  %v3524_v36 = vpack.c.bf16 %v212_v21, %v205_v20 }
  0x18   :  { %v3526_v37 = vpack.c.bf16 %v226_v24, %v219_v23  ;;  %v3529_v38 = vpack.c.bf16 %v240_v26, %v233_v25  ;;  %v126_v39 = vand.u32 4294901760, %v125_v5  ;;  %v164_v40 = vsub.f32 %v3456_v48, %v163_v58 }
  0x19   :  { %v3533_v41 = vpack.c.bf16 %v144_v11, %v137_v10  ;;  %v151_v46 = vand.u32 4294901760, %v150_v6  ;;  %v158_v47 = vand.u32 4294901760, %v157_v14  ;;  %v171_v53 = vsub.f32 %v3468_v55, %v170_v7 }
  0x1a   :  { %2986 = vmatpush3.bf16.msra.mxu0 %v3459_v49  ;;  %v178_v54 = vsub.f32 %v3474_v59, %v177_v15  ;;  %v165_v57 = vand.u32 4294901760, %v164_v40  ;;  %v185_v58 = vsub.f32 %v3477_v60, %v184_v16  ;;  %v192_v11 = vsub.f32 %v3479_v61, %v191_v17 }
  0x1b   :  { %2987 = vmatprep.subr.bf16.mxu0 %v3329_v3  ;;  %v3539_v56 = vpack.c.bf16 %v158_v47, %v151_v46  ;;  %v172_v5 = vand.u32 4294901760, %v171_v53  ;;  %v199_v14 = vsub.f32 %v3481_v62, %v198_v19  ;;  %v206_v15 = vsub.f32 %v3483_v63, %v205_v20 }
  0x1c   :  { %v179_v6 = vand.u32 4294901760, %v178_v54  ;;  %v186_v10 = vand.u32 4294901760, %v185_v58  ;;  %v213_v46 = vsub.f32 %v3485_v0, %v212_v21  ;;  %v220_v47 = vsub.f32 %v3487_v1, %v219_v23 }
  0x1d   :  { %v3546_v7 = vpack.c.bf16 %v172_v5, %v165_v57  ;;  %v200_v40 = vand.u32 4294901760, %v199_v14  ;;  %v207_v19 = vand.u32 4294901760, %v206_v15  ;;  %v227_v20 = vsub.f32 %v3489_v2, %v226_v24 }
  0x1e   :  { %2989 = vmatpush3.bf16.msra.mxu0 %v3461_v50  ;;  %v3553_v16 = vpack.c.bf16 %v186_v10, %v179_v6  ;;  %v214_v53 = vand.u32 4294901760, %v213_v46  ;;  %v234_v54 = vsub.f32 %v3491_v4, %v233_v25  ;;  %v221_v21 = vand.u32 4294901760, %v220_v47 }
  0x1f   :  { %2990 = vmatprep.subr.bf16.mxu0 %v3329_v3  ;;  %v228_v5 = vand.u32 4294901760, %v227_v20  ;;  %v241_v23 = vsub.f32 %v3498_v9, %v240_v26  ;;  %v3580_v26 = vpack.c.bf16 %v3440_v35, %v3438_v34  ;;  %v3587_v10 = vpack.c.bf16 %v3449_v44, %v3447_v43 }
  0x20   :  { %v3565_v57 = vpack.c.bf16 %v214_v53, %v207_v19  ;;  %v235_v6 = vand.u32 4294901760, %v234_v54  ;;  %v3595_v34 = vpack.c.bf16 %v3468_v55, %v3456_v48  ;;  %v3601_v35 = vpack.c.bf16 %v3477_v60, %v3474_v59 }
  0x21   :  { %v3570_v58 = vpack.c.bf16 %v228_v5, %v221_v21  ;;  %v242_v24 = vand.u32 4294901760, %v241_v23  ;;  %v3607_v43 = vpack.c.bf16 %v3481_v62, %v3479_v61  ;;  %v3613_v44 = vpack.c.bf16 %v3485_v0, %v3483_v63 }
  0x22   :  { %2992 = vmatpush3.bf16.msra.mxu0 %v3463_v51  ;;  %v3619_v48 = vpack.c.bf16 %v3489_v2, %v3487_v1  ;;  %v3625_v55 = vpack.c.bf16 %v3498_v9, %v3491_v4  ;;  %vm687_vm1 = vcmask 1043456   ;;  %vm683_vm2 = vcmask 31744  }
  0x23   :  { %2993 = vmatprep.subr.bf16.mxu0 %v3329_v3  ;;  %v3574_v25 = vpack.c.bf16 %v242_v24, %v235_v6 }
  0x25   :  { %2522 = vmatmul.mubr.f32.vlgmr.msra.gmra.mrb[0].mxu0 %v126_v39  ;;  %v193_v39 = vand.u32 4294901760, %v192_v11 }
  0x26   :  { %2995 = vmatpush3.bf16.msra.mxu0 %v3533_v41  ;;  %2556 = vmatprep.mubr.msk.f32.mxu0 %vm3330_vm0, %v3331_v8 }
  0x27   :  { %2996 = vmatprep.subr.bf16.mxu0 %v3329_v3  ;;  %v3559_v17 = vpack.c.bf16 %v200_v40, %v193_v39 }
  0x2a   :  { %2998 = vmatpush3.bf16.msra.mxu0 %v3539_v56 }
  0x2b   :  { %2999 = vmatprep.subr.bf16.mxu0 %v3329_v3 }
  0x2e   :  { %3001 = vmatpush3.bf16.msra.mxu0 %v3546_v7 }
  0x2f   :  { %3002 = vmatprep.subr.bf16.mxu0 %v3329_v3 }
  0x32   :  { %3004 = vmatpush3.bf16.msra.mxu0 %v3553_v16 }
  0x33   :  { %3005 = vmatprep.subr.bf16.mxu0 %v3329_v3 }
  0x36   :  { %3007 = vmatpush3.bf16.msra.mxu0 %v3559_v17 }
  0x37   :  { %3008 = vmatprep.subr.bf16.mxu0 %v3329_v3 }
  0x3a   :  { %3010 = vmatpush3.bf16.msra.mxu0 %v3565_v57 }
  0x3b   :  { %3011 = vmatprep.subr.bf16.mxu0 %v3329_v3 }
  0x3e   :  { %3013 = vmatpush3.bf16.msra.mxu0 %v3570_v58 }
  0x3f   :  { %3014 = vmatprep.subr.bf16.mxu0 %v3329_v3 }
  0x42   :  { %3016 = vmatpush3.bf16.msra.mxu0 %v3574_v25 }
  0x43   :  { %3017 = vmatprep.subr.bf16.mxu0 %v3329_v3 }
  0x45   :  { %2557 = vmatmul.mubr.f32.vlgmr.msra.gmra.mrb[0].mxu0 %v3433_v31 }
  0x46   :  { %3019 = vmatpush3.bf16.msra.mxu0 %v3580_v26  ;;  %2591 = vmatprep.mubr.msk.f32.mxu0 %vm3330_vm0, %v3331_v8 }
  0x47   :  { %3020 = vmatprep.subr.bf16.mxu0 %v3329_v3 }
  0x4a   :  { %3022 = vmatpush3.bf16.msra.mxu0 %v3587_v10 }
  0x4b   :  { %3023 = vmatprep.subr.bf16.mxu0 %v3329_v3 }
  0x4e   :  { %3025 = vmatpush3.bf16.msra.mxu0 %v3595_v34 }
  0x4f   :  { %3026 = vmatprep.subr.bf16.mxu0 %v3329_v3 }
  0x52   :  { %3028 = vmatpush3.bf16.msra.mxu0 %v3601_v35 }
  0x53   :  { %3029 = vmatprep.subr.bf16.mxu0 %v3329_v3 }
  0x56   :  { %3031 = vmatpush3.bf16.msra.mxu0 %v3607_v43 }
  0x57   :  { %3032 = vmatprep.subr.bf16.mxu0 %v3329_v3 }
  0x5a   :  { %3034 = vmatpush3.bf16.msra.mxu0 %v3613_v44 }
  0x5b   :  { %3035 = vmatprep.subr.bf16.mxu0 %v3329_v3 }
  0x5e   :  { %3037 = vmatpush3.bf16.msra.mxu0 %v3619_v48 }
  0x5f   :  { %3038 = vmatprep.subr.bf16.mxu0 %v3329_v3 }
  0x62   :  { %3040 = vmatpush3.bf16.msra.mxu0 %v3625_v55 }
  0x63   :  { %3041 = vmatprep.subr.bf16.mxu0 %v3329_v3 }
  0x65   :  { %2592 = vmatmul.mubr.f32.vlgmr.msra.gmra.mrb[0].mxu0 %v3445_v42  ;;  %v40_v42 = vld [vmem:[%s3891_s3] sm:$0xf] }
  0x66   :  { %3043 = vmatpush3.bf16.msra.mxu0 %v3387_v12  ;;  %2626 = vmatprep.mubr.msk.f32.mxu0 %vm3330_vm0, %v3331_v8 }
  0x67   :  { %3044 = vmatprep.subr.bf16.mxu0 %v3329_v3 }
  0x6a   :  { %3046 = vmatpush3.bf16.msra.mxu0 %v3390_v13 }
  0x6b   :  { %3047 = vmatprep.subr.bf16.mxu0 %v3329_v3 }
  0x6e   :  { %3049 = vmatpush3.bf16.msra.mxu0 %v3400_v18 }
  0x6f   :  { %3050 = vmatprep.subr.bf16.mxu0 %v3329_v3 }
  0x72   :  { %3052 = vmatpush3.bf16.msra.mxu0 %v3436_v32 }
  0x73   :  { %3053 = vmatprep.subr.bf16.mxu0 %v3329_v3 }
  0x76   :  { %3055 = vmatpush3.bf16.msra.mxu0 %v3452_v45 }
  0x77   :  { %3056 = vmatprep.subr.bf16.mxu0 %v3329_v3 }
  0x7a   :  { %3058 = vmatpush3.bf16.msra.mxu0 %v3459_v49 }
  0x7b   :  { %3059 = vmatprep.subr.bf16.mxu0 %v3329_v3 }
  0x7e   :  { %3061 = vmatpush3.bf16.msra.mxu0 %v3461_v50 }
  0x7f   :  { %3062 = vmatprep.subr.bf16.mxu0 %v3329_v3 }
  0x82   :  { %3064 = vmatpush3.bf16.msra.mxu0 %v3463_v51 }
  0x83   :  { %3065 = vmatprep.subr.bf16.mxu0 %v3329_v3 }
  0x85   :  { %2627 = vmatmul.mubr.f32.vlgmr.msra.gmra.mrb[0].mxu0 %v124_v52  ;;  %v689_v52 = vsel %vm687_vm1, %v40_v42, 0 }
  0x86   :  { %3067 = vmatpush3.bf16.msra.mxu0 %v3513_v27  ;;  %2661 = vmatprep.mubr.msk.f32.mxu0 %vm3330_vm0, %v3331_v8  ;;  %v3694_v59 = vand.u32 4294901760, %v689_v52 }
  0x87   :  { %3068 = vmatprep.subr.bf16.mxu0 %v3329_v3 }
  0x88   :  { %2700 = vmatpush3.msra.mxu1 %v3694_v59 }
  0x89   :  { %2704 = vmatprep.subr.mxu1 %v3331_v8 }
  0x8a   :  { %3070 = vmatpush3.bf16.msra.mxu0 %v3515_v28 }
  0x8b   :  { %3071 = vmatprep.subr.bf16.mxu0 %v3329_v3 }
  0x8e   :  { %3073 = vmatpush3.bf16.msra.mxu0 %v3517_v29 }
  0x8f   :  { %3074 = vmatprep.subr.bf16.mxu0 %v3329_v3 }
  0x92   :  { %3076 = vmatpush3.bf16.msra.mxu0 %v3520_v30 }
  0x93   :  { %3077 = vmatprep.subr.bf16.mxu0 %v3329_v3 }
  0x96   :  { %3079 = vmatpush3.bf16.msra.mxu0 %v3522_v33 }
  0x97   :  { %3080 = vmatprep.subr.bf16.mxu0 %v3329_v3 }
  0x9a   :  { %3082 = vmatpush3.bf16.msra.mxu0 %v3524_v36 }
  0x9b   :  { %3083 = vmatprep.subr.bf16.mxu0 %v3329_v3 }
  0x9e   :  { %3085 = vmatpush3.bf16.msra.mxu0 %v3526_v37 }
  0x9f   :  { %3086 = vmatprep.subr.bf16.mxu0 %v3329_v3 }
  0xa2   :  { %3088 = vmatpush3.bf16.msra.mxu0 %v3529_v38 }
  0xa3   :  { %3089 = vmatprep.subr.bf16.mxu0 %v3329_v3 }
  0xa5   :  { %2662 = vmatmul.mubr.f32.vlgmr.msra.gmra.mrb[0].mxu0 %v3433_v31 }
  0xa6   :  { %3091 = vmatpush3.bf16.msra.mxu0 %v3387_v12  ;;  %2696 = vmatprep.mubr.msk.f32.mxu0 %vm3330_vm0, %v3331_v8 }
  0xa7   :  { %3092 = vmatprep.subr.bf16.mxu0 %v3329_v3 }
  0xaa   :  { %3094 = vmatpush3.bf16.msra.mxu0 %v3390_v13 }
  0xab   :  { %3095 = vmatprep.subr.bf16.mxu0 %v3329_v3 }
  0xae   :  { %3097 = vmatpush3.bf16.msra.mxu0 %v3400_v18 }
  0xaf   :  { %3098 = vmatprep.subr.bf16.mxu0 %v3329_v3 }
  0xb2   :  { %3100 = vmatpush3.bf16.msra.mxu0 %v3436_v32 }
  0xb3   :  { %3101 = vmatprep.subr.bf16.mxu0 %v3329_v3 }
  0xb6   :  { %3103 = vmatpush3.bf16.msra.mxu0 %v3452_v45 }
  0xb7   :  { %3104 = vmatprep.subr.bf16.mxu0 %v3329_v3 }
  0xba   :  { %3106 = vmatpush3.bf16.msra.mxu0 %v3459_v49 }
  0xbb   :  { %3107 = vmatprep.subr.bf16.mxu0 %v3329_v3 }
  0xbe   :  { %3109 = vmatpush3.bf16.msra.mxu0 %v3461_v50 }
  0xbf   :  { %3110 = vmatprep.subr.bf16.mxu0 %v3329_v3 }
  0xc2   :  { %3112 = vmatpush3.bf16.msra.mxu0 %v3463_v51 }
  0xc3   :  { %2939 = vmatprep.subr.mxu0 %v3331_v8 }
  0xc5   :  { %2697 = vmatmul.mubr.f32.vlgmr.msra.gmra.mrb[0].mxu0 %v3433_v31  ;;  %v3701_v31 = vsub.f32 %v689_v52, %v3694_v59 }
  0xc6   :  { %2941 = vmatprep.mubr.msk.f32.mxu0 %vm3330_vm0, %v3331_v8  ;;  %2940 = vmatpush3.msra.mxu0 %v3694_v59 }
  0xc7   :  { %2944 = vmatprep.subr.mxu0 %v3331_v8  ;;  %v3705_v0 = vand.u32 4294901760, %v3701_v31 }
  0xc9   :  { %v771_v4 = vsub.f32 %v3701_v31, %v3705_v0 }
  0xcb   :  { %v3709_v14 = vand.u32 4294901760, %v771_v4 }
 0x198   :  { %v678_v60 = vpop.f32.mrb[0].mxu0 }
 0x199   :  { %v682_v61 = vmul.f32 0.03125, %v678_v60  ;;  %v2698_v62 = vpop.f32.mrb[1].mxu0 }
 0x19b   :  { %v685_v63 = vsel %vm683_vm2, %v682_v61, 0 }
 0x19c   :  { %v757_v1 = vand.u32 4294901760, %v685_v63 }
 0x19e   :  { %v758_v2 = vsub.f32 %v685_v63, %v757_v1 }
 0x1a0   :  { %v759_v9 = vand.u32 4294901760, %v758_v2 }
 0x1a2   :  { %v760_v11 = vsub.f32 %v758_v2, %v759_v9 }
 0x1a4   :  { %v761_v15 = vand.u32 4294901760, %v760_v11 }
 0x1a6   :  { %2702 = vmatmul.mubr.f32.vlgmr.msra.gmra.mrb[0].mxu1 %v761_v15 }
 0x1a7   :  { %2705 = vmatpush3.msra.mxu1 %v3709_v14  ;;  %2706 = vmatprep.mubr.msk.f32.mxu1 %vm3330_vm0, %v3331_v8 }
 0x1a8   :  { %2709 = vmatprep.subr.mxu1 %v3331_v8 }
 0x1ae   :  { %2707 = vmatmul.mubr.f32.vlgmr.msra.gmra.mrb[0].mxu1 %v757_v1 }
 0x1af   :  { %2710 = vmatpush3.msra.mxu1 %v3701_v31  ;;  %2711 = vmatprep.mubr.msk.f32.mxu1 %vm3330_vm0, %v3331_v8 }
 0x1b0   :  { %2714 = vmatprep.subr.mxu1 %v3331_v8 }
 0x1b6   :  { %2712 = vmatmul.mubr.f32.vlgmr.msra.gmra.mrb[0].mxu1 %v758_v2 }
 0x1b7   :  { %2715 = vmatpush3.msra.mxu1 %v3694_v59  ;;  %2716 = vmatprep.mubr.msk.f32.mxu1 %vm3330_vm0, %v3331_v8 }
 0x1b8   :  { %2719 = vmatprep.subr.mxu1 %v3331_v8 }
 0x1be   :  { %2717 = vmatmul.mubr.f32.vlgmr.msra.gmra.mrb[0].mxu1 %v759_v9 }
 0x1bf   :  { %2720 = vmatpush3.msra.mxu1 %v3705_v0  ;;  %2721 = vmatprep.mubr.msk.f32.mxu1 %vm3330_vm0, %v3331_v8 }
 0x1c0   :  { %2724 = vmatprep.subr.mxu1 %v3331_v8 }
 0x1c6   :  { %2722 = vmatmul.mubr.f32.vlgmr.msra.gmra.mrb[0].mxu1 %v757_v1 }
 0x1c7   :  { %2725 = vmatpush3.msra.mxu1 %v3694_v59  ;;  %2726 = vmatprep.mubr.msk.f32.mxu1 %vm3330_vm0, %v3331_v8 }
 0x1c8   :  { %3113 = vmatprep.subr.bf16.mxu1 %v3329_v3 }
 0x1ce   :  { %2727 = vmatmul.mubr.f32.vlgmr.msra.gmra.mrb[0].mxu1 %v757_v1 }
 0x1cf   :  { %3115 = vmatpush3.bf16.msra.mxu1 %v3387_v12  ;;  %2761 = vmatprep.mubr.msk.f32.mxu1 %vm3330_vm0, %v3331_v8 }
 0x1d0   :  { %3116 = vmatprep.subr.bf16.mxu1 %v3329_v3 }
 0x1d3   :  { %3118 = vmatpush3.bf16.msra.mxu1 %v3390_v13 }
 0x1d4   :  { %3119 = vmatprep.subr.bf16.mxu1 %v3329_v3 }
 0x1d7   :  { %3121 = vmatpush3.bf16.msra.mxu1 %v3400_v18 }
 0x1d8   :  { %3122 = vmatprep.subr.bf16.mxu1 %v3329_v3 }
 0x1db   :  { %3124 = vmatpush3.bf16.msra.mxu1 %v3436_v32 }
 0x1dc   :  { %3125 = vmatprep.subr.bf16.mxu1 %v3329_v3 }
 0x1df   :  { %3127 = vmatpush3.bf16.msra.mxu1 %v3452_v45 }
 0x1e0   :  { %3128 = vmatprep.subr.bf16.mxu1 %v3329_v3 }
 0x1e3   :  { %3130 = vmatpush3.bf16.msra.mxu1 %v3459_v49 }
 0x1e4   :  { %3131 = vmatprep.subr.bf16.mxu1 %v3329_v3 }
 0x1e7   :  { %3133 = vmatpush3.bf16.msra.mxu1 %v3461_v50 }
 0x1e8   :  { %3134 = vmatprep.subr.bf16.mxu1 %v3329_v3 }
 0x1eb   :  { %3136 = vmatpush3.bf16.msra.mxu1 %v3463_v51 }
 0x1ec   :  { %3137 = vmatprep.subr.bf16.mxu1 %v3329_v3 }
 0x2a1   :  { %v1133_v39 = vpop.f32.mrb[0].mxu1 }
 0x2a2   :  { %v3750_v40 = vsub.f32 %v3408_v22, %v1133_v39  ;;  %v2728_v46 = vpop.f32.mrb[1].mxu1 }
 0x2a4   :  { %v1138_v47 = vmul.f32 %v3750_v40, %v3750_v40 }
 0x2a6   :  { %v3754_v19 = vand.u32 4294901760, %v1138_v47 }
 0x2a8   :  { %v1221_v53 = vsub.f32 %v1138_v47, %v3754_v19 }
 0x2aa   :  { %v1222_v20 = vand.u32 4294901760, %v1221_v53 }
 0x2ac   :  { %v1223_v54 = vsub.f32 %v1221_v53, %v1222_v20 }
 0x2ae   :  { %v1224_v21 = vand.u32 4294901760, %v1223_v54 }
 0x2b0   :  { %2762 = vmatmul.mubr.f32.vlgmr.msra.gmra.mrb[2].mxu1 %v1224_v21 }
 0x2b1   :  { %3139 = vmatpush3.bf16.msra.mxu1 %v3533_v41  ;;  %2796 = vmatprep.mubr.msk.f32.mxu1 %vm3330_vm0, %v3331_v8 }
 0x2b2   :  { %3140 = vmatprep.subr.bf16.mxu1 %v3329_v3 }
 0x2b5   :  { %3142 = vmatpush3.bf16.msra.mxu1 %v3539_v56  ;;  %v2244_v56 = vstv %s3889_s1 }
 0x2b6   :  { %3143 = vmatprep.subr.bf16.mxu1 %v3329_v3 }
 0x2b9   :  { %3145 = vmatpush3.bf16.msra.mxu1 %v3546_v7 }
 0x2ba   :  { %3146 = vmatprep.subr.bf16.mxu1 %v3329_v3 }
 0x2bd   :  { %3148 = vmatpush3.bf16.msra.mxu1 %v3553_v16 }
 0x2be   :  { %3149 = vmatprep.subr.bf16.mxu1 %v3329_v3 }
 0x2c1   :  { %3151 = vmatpush3.bf16.msra.mxu1 %v3559_v17 }
 0x2c2   :  { %3152 = vmatprep.subr.bf16.mxu1 %v3329_v3 }
 0x2c5   :  { %3154 = vmatpush3.bf16.msra.mxu1 %v3565_v57 }
 0x2c6   :  { %3155 = vmatprep.subr.bf16.mxu1 %v3329_v3 }
 0x2c9   :  { %3157 = vmatpush3.bf16.msra.mxu1 %v3570_v58 }
 0x2ca   :  { %3158 = vmatprep.subr.bf16.mxu1 %v3329_v3 }
 0x2cd   :  { %3160 = vmatpush3.bf16.msra.mxu1 %v3574_v25 }
 0x2ce   :  { %3161 = vmatprep.subr.bf16.mxu1 %v3329_v3 }
 0x2d0   :  { %2797 = vmatmul.mubr.f32.vlgmr.msra.gmra.mrb[2].mxu1 %v3754_v19 }
 0x2d1   :  { %3163 = vmatpush3.bf16.msra.mxu1 %v3580_v26  ;;  %2831 = vmatprep.mubr.msk.f32.mxu1 %vm3330_vm0, %v3331_v8 }
 0x2d2   :  { %3164 = vmatprep.subr.bf16.mxu1 %v3329_v3 }
 0x2d5   :  { %3166 = vmatpush3.bf16.msra.mxu1 %v3587_v10 }
 0x2d6   :  { %3167 = vmatprep.subr.bf16.mxu1 %v3329_v3 }
 0x2d9   :  { %3169 = vmatpush3.bf16.msra.mxu1 %v3595_v34 }
 0x2da   :  { %3170 = vmatprep.subr.bf16.mxu1 %v3329_v3 }
 0x2dd   :  { %3172 = vmatpush3.bf16.msra.mxu1 %v3601_v35 }
 0x2de   :  { %3173 = vmatprep.subr.bf16.mxu1 %v3329_v3 }
 0x2e1   :  { %3175 = vmatpush3.bf16.msra.mxu1 %v3607_v43 }
 0x2e2   :  { %3176 = vmatprep.subr.bf16.mxu1 %v3329_v3 }
 0x2e5   :  { %3178 = vmatpush3.bf16.msra.mxu1 %v3613_v44 }
 0x2e6   :  { %3179 = vmatprep.subr.bf16.mxu1 %v3329_v3 }
 0x2e9   :  { %3181 = vmatpush3.bf16.msra.mxu1 %v3619_v48 }
 0x2ea   :  { %3182 = vmatprep.subr.bf16.mxu1 %v3329_v3 }
 0x2ed   :  { %3184 = vmatpush3.bf16.msra.mxu1 %v3625_v55 }
 0x2ee   :  { %3185 = vmatprep.subr.bf16.mxu1 %v3329_v3 }
 0x2f0   :  { %2832 = vmatmul.mubr.f32.vlgmr.msra.gmra.mrb[2].mxu1 %v1221_v53 }
 0x2f1   :  { %3187 = vmatpush3.bf16.msra.mxu1 %v3387_v12  ;;  %2866 = vmatprep.mubr.msk.f32.mxu1 %vm3330_vm0, %v3331_v8 }
 0x2f2   :  { %3188 = vmatprep.subr.bf16.mxu1 %v3329_v3 }
 0x2f5   :  { %3190 = vmatpush3.bf16.msra.mxu1 %v3390_v13 }
 0x2f6   :  { %3191 = vmatprep.subr.bf16.mxu1 %v3329_v3 }
 0x2f9   :  { %3193 = vmatpush3.bf16.msra.mxu1 %v3400_v18 }
 0x2fa   :  { %3194 = vmatprep.subr.bf16.mxu1 %v3329_v3 }
 0x2fd   :  { %3196 = vmatpush3.bf16.msra.mxu1 %v3436_v32 }
 0x2fe   :  { %3197 = vmatprep.subr.bf16.mxu1 %v3329_v3 }
 0x301   :  { %3199 = vmatpush3.bf16.msra.mxu1 %v3452_v45 }
 0x302   :  { %3200 = vmatprep.subr.bf16.mxu1 %v3329_v3 }
 0x305   :  { %3202 = vmatpush3.bf16.msra.mxu1 %v3459_v49 }
 0x306   :  { %3203 = vmatprep.subr.bf16.mxu1 %v3329_v3 }
 0x309   :  { %3205 = vmatpush3.bf16.msra.mxu1 %v3461_v50 }
 0x30a   :  { %3206 = vmatprep.subr.bf16.mxu1 %v3329_v3 }
 0x30d   :  { %3208 = vmatpush3.bf16.msra.mxu1 %v3463_v51 }
 0x30e   :  { %3209 = vmatprep.subr.bf16.mxu1 %v3329_v3 }
 0x310   :  { %2867 = vmatmul.mubr.f32.vlgmr.msra.gmra.mrb[2].mxu1 %v1222_v20 }
 0x311   :  { %3211 = vmatpush3.bf16.msra.mxu1 %v3513_v27  ;;  %2901 = vmatprep.mubr.msk.f32.mxu1 %vm3330_vm0, %v3331_v8 }
 0x312   :  { %3212 = vmatprep.subr.bf16.mxu1 %v3329_v3 }
 0x315   :  { %3214 = vmatpush3.bf16.msra.mxu1 %v3515_v28 }
 0x316   :  { %3215 = vmatprep.subr.bf16.mxu1 %v3329_v3 }
 0x319   :  { %3217 = vmatpush3.bf16.msra.mxu1 %v3517_v29 }
 0x31a   :  { %3218 = vmatprep.subr.bf16.mxu1 %v3329_v3 }
 0x31d   :  { %3220 = vmatpush3.bf16.msra.mxu1 %v3520_v30 }
 0x31e   :  { %3221 = vmatprep.subr.bf16.mxu1 %v3329_v3 }
 0x321   :  { %3223 = vmatpush3.bf16.msra.mxu1 %v3522_v33 }
 0x322   :  { %3224 = vmatprep.subr.bf16.mxu1 %v3329_v3 }
 0x325   :  { %3226 = vmatpush3.bf16.msra.mxu1 %v3524_v36 }
 0x326   :  { %3227 = vmatprep.subr.bf16.mxu1 %v3329_v3 }
 0x329   :  { %3229 = vmatpush3.bf16.msra.mxu1 %v3526_v37 }
 0x32a   :  { %3230 = vmatprep.subr.bf16.mxu1 %v3329_v3 }
 0x32d   :  { %3232 = vmatpush3.bf16.msra.mxu1 %v3529_v38 }
 0x32e   :  { %3233 = vmatprep.subr.bf16.mxu1 %v3329_v3 }
 0x330   :  { %2902 = vmatmul.mubr.f32.vlgmr.msra.gmra.mrb[2].mxu1 %v3754_v19 }
 0x331   :  { %3235 = vmatpush3.bf16.msra.mxu1 %v3387_v12  ;;  %2936 = vmatprep.mubr.msk.f32.mxu1 %vm3330_vm0, %v3331_v8 }
 0x332   :  { %3236 = vmatprep.subr.bf16.mxu1 %v3329_v3 }
 0x335   :  { %3238 = vmatpush3.bf16.msra.mxu1 %v3390_v13 }
 0x336   :  { %3239 = vmatprep.subr.bf16.mxu1 %v3329_v3 }
 0x339   :  { %3241 = vmatpush3.bf16.msra.mxu1 %v3400_v18 }
 0x33a   :  { %3242 = vmatprep.subr.bf16.mxu1 %v3329_v3 }
 0x33d   :  { %3244 = vmatpush3.bf16.msra.mxu1 %v3436_v32 }
 0x33e   :  { %3245 = vmatprep.subr.bf16.mxu1 %v3329_v3 }
 0x341   :  { %3247 = vmatpush3.bf16.msra.mxu1 %v3452_v45 }
 0x342   :  { %3248 = vmatprep.subr.bf16.mxu1 %v3329_v3 }
 0x345   :  { %3250 = vmatpush3.bf16.msra.mxu1 %v3459_v49 }
 0x346   :  { %3251 = vmatprep.subr.bf16.mxu1 %v3329_v3 }
 0x349   :  { %3253 = vmatpush3.bf16.msra.mxu1 %v3461_v50 }
 0x34a   :  { %3254 = vmatprep.subr.bf16.mxu1 %v3329_v3  ;;  %v1791_v3 = vstv %s3888_s0 }
 0x34d   :  { %3256 = vmatpush3.bf16.msra.mxu1 %v3463_v51 }
 0x350   :  { %2937 = vmatmul.mubr.f32.vlgmr.msra.gmra.mrb[2].mxu1 %v3754_v19 }
 0x423   :  { %v1776_v12 = vpop.f32.mrb[2].mxu1 }
 0x424   :  { %v1780_v13 = vmul.f32 0.032258064, %v1776_v12  ;;  %v2938_v18 = vpop.f32.mrb[3].mxu1 }
 0x426   :  { %3301 = vrsqrt.f32 %v1780_v13  ;;  %vm1783_vm3 = vcmp.eq.f32.partialorder %v1780_v13, inf  ;;  %v1786_v45 = vand.u32 2147483648, %v1780_v13  ;;  %vm1785_vm4 = vcmp.eq.f32.partialorder %v1780_v13, 0.0 }
 0x430   :  { %v3302_v22 = vpop.eup %3301 }
 0x431   :  { %v1782_v32 = vmul.f32 %v3302_v22, %v1780_v13 }
 0x433   :  { %v1784_v27 = vsel %vm1783_vm3, %v1780_v13, %v1782_v32 }
 0x434   :  { %v1787_v49 = vsel %vm1785_vm4, %v1786_v45, %v1784_v27 }
 0x435   :  { %v1788_v28 = vadd.f32 1e-06, %v1787_v49 }
 0x437   :  { %3303 = vrcp.f32 %v1788_v28 }
 0x441   :  { %v3304_v50 = vpop.eup %3303 }
 0x442   :  { %v1792_v51 = vmul.f32 %v3304_v50, %v1791_v3 }
 0x444   :  { %v1794_v29 = vsel %vm683_vm2, %v1792_v51, 0 }
 0x445   :  { %v1862_v30 = vand.u32 4294901760, %v1794_v29 }
 0x447   :  { %v1863_v33 = vsub.f32 %v1794_v29, %v1862_v30 }
 0x449   :  { %v1864_v36 = vand.u32 4294901760, %v1863_v33 }
 0x44b   :  { %v1865_v37 = vsub.f32 %v1863_v33, %v1864_v36 }
 0x44d   :  { %v1866_v38 = vand.u32 4294901760, %v1865_v37 }
 0x44f   :  { %2942 = vmatmul.mubr.f32.vlgmr.msra.gmra.mrb[2].mxu0 %v1866_v38 }
 0x450   :  { %2945 = vmatpush3.msra.mxu0 %v3709_v14  ;;  %2946 = vmatprep.mubr.msk.f32.mxu0 %vm3330_vm0, %v3331_v8 }
 0x451   :  { %2949 = vmatprep.subr.mxu0 %v3331_v8 }
 0x457   :  { %2947 = vmatmul.mubr.f32.vlgmr.msra.gmra.mrb[2].mxu0 %v1862_v30 }
 0x458   :  { %2950 = vmatpush3.msra.mxu0 %v3701_v31  ;;  %2951 = vmatprep.mubr.msk.f32.mxu0 %vm3330_vm0, %v3331_v8 }
 0x459   :  { %2954 = vmatprep.subr.mxu0 %v3331_v8 }
 0x45f   :  { %2952 = vmatmul.mubr.f32.vlgmr.msra.gmra.mrb[2].mxu0 %v1863_v33 }
 0x460   :  { %2955 = vmatpush3.msra.mxu0 %v3694_v59  ;;  %2956 = vmatprep.mubr.msk.f32.mxu0 %vm3330_vm0, %v3331_v8 }
 0x461   :  { %2959 = vmatprep.subr.mxu0 %v3331_v8 }
 0x467   :  { %2957 = vmatmul.mubr.f32.vlgmr.msra.gmra.mrb[2].mxu0 %v1864_v36 }
 0x468   :  { %2960 = vmatpush3.msra.mxu0 %v3705_v0  ;;  %2961 = vmatprep.mubr.msk.f32.mxu0 %vm3330_vm0, %v3331_v8 }
 0x469   :  { %2964 = vmatprep.subr.mxu0 %v3331_v8 }
 0x46f   :  { %2962 = vmatmul.mubr.f32.vlgmr.msra.gmra.mrb[2].mxu0 %v1862_v30 }
 0x470   :  { %2965 = vmatpush3.msra.mxu0 %v3694_v59  ;;  %2966 = vmatprep.mubr.msk.f32.mxu0 %vm3330_vm0, %v3331_v8 }
 0x477   :  { %2967 = vmatmul.mubr.f32.vlgmr.msra.gmra.mrb[2].mxu0 %v1862_v30 }
 0x54a   :  { %v2238_v41 = vpop.f32.mrb[2].mxu0 }
 0x54b   :  { %v2242_v7 = vmul.f32 %v2238_v41, %v3750_v40  ;;  %v2968_v16 = vpop.f32.mrb[3].mxu0 }
 0x54d   :  { %v2245_v17 = vadd.f32 %v2244_v56, %v2242_v7 }
 0x54f   :  { %2246 = vst [vmem:[#allocation4] sm:$0xf] %v2245_v17 }
 0x550   :  { %3316 = shalt.err (!%p3313_p4)
}
 0x551   :  { %s3317_s9 = scalar_lea.hbm %s3893_s5, 64 }
 0x552   :  { %p3318_p5 = scmp.ne.s32.totalorder %s3893_s5, %s3317_s9  ;;  %p3321_p6 = scmp.lt.u32.totalorder %s3317_s9, %s3893_s5 }
 0x554   :  { %p3323_p7 = pnand %p3321_p6, %p3318_p5 }
 0x556   :  { %3326 = shalt.err (!%p3323_p7)
}
 0x557   :  { %2256 = dma.vmem_to_hbm [thread:$0]  %s2254_s30, 64, %s3893_s5, [#allocation5]  }
 0x558   :  { %3327 = dma.done.wait [#allocation5], 64  }
 0x559   :  { %3328 = vsyncadd [#allocation5], 4294967232 }
 0x55a   :  { %2260 = vsyncpa [#allocation5], 1 }

</bundles_post_ra>
